<compile_context>
chip_gen: v5e
topology: v5e:2x2
jax: 0.10.0
libtpu: 0.0.40
codegen_flags: <defaults>
</compile_context>

<pallas_src>
import functools

import jax
import jax.numpy as jnp
from jax.experimental import pallas as pl
from jax.experimental.pallas import tpu as pltpu


# ----------------------------------------------------------------------------
# Kernel: per-block channel mix  out[b, o, l] = sum_c M[o, c] * x[b, c, l]
# M lives in SMEM ((C, C), tiny); x/out blocks are (TB, C, TL) VMEM tiles.
# ----------------------------------------------------------------------------
def _pointwise_kernel(m_ref, x_ref, out_ref, *, num_channels: int):
    x = x_ref[...]                                     # (TB, C, TL)
    mixed = []
    for o in range(num_channels):
        acc = m_ref[o, 0] * x[:, 0, :]
        for c in range(1, num_channels):
            acc = acc + m_ref[o, c] * x[:, c, :]
        mixed.append(acc)                              # (TB, TL)
    out_ref[...] = jnp.stack(mixed, axis=1).astype(out_ref.dtype)


def _pick_spatial_tile(hw: int, max_tile: int = 2048) -> int:
    # Last block dim must be a multiple of 128 or equal the full extent.
    if hw % 128 != 0 or hw <= max_tile:
        return hw
    return max_tile


def pointwise_flow_pallas(x_nchw, w, inverse: bool):
    B, C, H, W = x_nchw.shape
    assert w.shape == (C, C)
    HW = H * W
    x = x_nchw.reshape(B, C, HW)                       # keep input dtype

    # One-time (C, C) work in the wrapper: direction matrix + analytic logdet.
    m = (jnp.linalg.inv(w) if inverse else w).astype(jnp.float32)
    sign = -1.0 if inverse else 1.0
    logd_scalar = sign * H * W * jnp.linalg.slogdet(w.astype(jnp.float32))[1]
    # TODO(synk): PyTorch computes slogdet in float64; JAX x64 is disabled by
    # default so this uses float32 (negligible for well-conditioned W).
    logd = jnp.full((B,), logd_scalar, dtype=x_nchw.dtype)

    # Tiling: lane-dense spatial tiles, batch-chunked to ~2 MiB per block.
    TL = _pick_spatial_tile(HW)
    bytes_per_batch_row = C * TL * x.dtype.itemsize
    TB = max(1, min(B, (2 * 1024 * 1024) // max(bytes_per_batch_row, 1)))
    grid = (pl.cdiv(B, TB), pl.cdiv(HW, TL))

    kernel = functools.partial(_pointwise_kernel, num_channels=C)
    out = pl.pallas_call(
        kernel,
        out_shape=jax.ShapeDtypeStruct((B, C, HW), x.dtype),
        grid=grid,
        in_specs=[
            # Whole (C, C) mix matrix in SMEM (no tiling, no HBM broadcast).
            pl.BlockSpec(memory_space=pltpu.MemorySpace.SMEM),
            pl.BlockSpec((TB, C, TL), lambda i, j: (i, 0, j)),
        ],
        out_specs=pl.BlockSpec((TB, C, TL), lambda i, j: (i, 0, j)),
        compiler_params=pltpu.CompilerParams(
            dimension_semantics=("parallel", "parallel")),
    )(m, x)

    y = out.reshape(B, C, H, W)
    return y, logd


# ----------------------------------------------------------------------------
# Flow classes mirroring the PyTorch module hierarchy.
# ----------------------------------------------------------------------------
class BaseFlow:
    def forward(self, input_, *, aux, inverse: bool):
        raise NotImplementedError

    def __str__(self):
        return self.__class__.__name__


class Pointwise(BaseFlow):
    """Invertible 1x1 channel mixing; hot path runs in the Pallas kernel."""

    def __init__(self, channels: int, key, noisy_identity_init: float = 0.001):
        self.w = (jnp.eye(channels, dtype=jnp.float32)
                  + noisy_identity_init
                  * jax.random.normal(key, (channels, channels), jnp.float32))

    def forward(self, input_, *, aux, inverse: bool):
        del aux  # unconditional flow
        B, C, H, W = input_.shape
        assert self.w.shape == (C, C)
        y, logd = pointwise_flow_pallas(input_, self.w, inverse)
        assert y.shape == input_.shape and logd.shape == (B,)
        return y, logd


# ----------------------------------------------------------------------------
# Pure-JAX reference for verification.
# ----------------------------------------------------------------------------
def _reference(x_nchw, w, inverse: bool):
    B, C, H, W = x_nchw.shape
    m = jnp.linalg.inv(w) if inverse else w
    y = jnp.einsum('oc,bchw->bohw', m, x_nchw)
    sign = -1.0 if inverse else 1.0
    logd = sign * H * W * jnp.linalg.slogdet(w)[1] * jnp.ones((B,), x_nchw.dtype)
    return y, logd


if __name__ == "__main__":
    key = jax.random.PRNGKey(0)
    k_x, k_w = jax.random.split(key)

    B, C, H, W = 2, 4, 16, 16
    x = jax.random.normal(k_x, (B, C, H, W), jnp.float32)

    flow = Pointwise(C, k_w)

    # Forward direction (x -> z).
    z, logd = flow.forward(x, aux=None, inverse=False)
    z = jax.block_until_ready(z)
    logd = jax.block_until_ready(logd)

    z_ref, logd_ref = _reference(x, flow.w, inverse=False)
    assert z.shape == (B, C, H, W) and logd.shape == (B,)
    assert jnp.allclose(z, z_ref, atol=1e-5, rtol=1e-5)
    assert jnp.allclose(logd, logd_ref, atol=1e-4, rtol=1e-5)

    # Inverse direction (z -> x): should recover x, logdets cancel.
    x_rec, logd_inv = flow.forward(z, aux=None, inverse=True)
    x_rec = jax.block_until_ready(x_rec)
    assert jnp.allclose(x_rec, x, atol=1e-4, rtol=1e-4)
    assert jnp.allclose(logd + logd_inv, 0.0, atol=1e-4)

    print("KERNEL_OK")
</pallas_src>

<mosaic_0001>
module attributes {stable_mosaic.version = 11 : i64} {
  func.func @_pointwise_kernel(%arg0: i32, %arg1: i32, %arg2: memref<4x4xf32, #tpu.memory_space<smem>>, %arg3: memref<2x4x256xf32, #tpu.memory_space<vmem>>, %arg4: memref<2x4x256xf32, #tpu.memory_space<vmem>>) attributes {dimension_semantics = [#tpu.dimension_semantics<parallel>, #tpu.dimension_semantics<parallel>], iteration_bounds = array<i64: 1, 1>, scalar_prefetch = 0 : i64, scratch_operands = 0 : i64, tpu.core_type = #tpu.core_type<tc>, window_params = [{transform_indices = @transform_0, window_bounds = array<i64: 4, 4>}, {transform_indices = @transform_1, window_bounds = array<i64: 2, 4, 256>}, {transform_indices = @transform_2, window_bounds = array<i64: 2, 4, 256>}]} {
    %c0 = arith.constant 0 : index
    %c0_0 = arith.constant 0 : index
    %c0_1 = arith.constant 0 : index
    %0 = vector.load %arg3[%c0, %c0_0, %c0_1] : memref<2x4x256xf32, #tpu.memory_space<vmem>>, vector<2x4x256xf32>
    %c0_2 = arith.constant 0 : index
    %c0_3 = arith.constant 0 : index
    %1 = memref.load %arg2[%c0_2, %c0_3] : memref<4x4xf32, #tpu.memory_space<smem>>
    %2 = vector.extract_strided_slice %0 {offsets = [0, 0, 0], sizes = [2, 1, 256], strides = [1, 1, 1]} : vector<2x4x256xf32> to vector<2x1x256xf32>
    %3 = vector.shape_cast %2 : vector<2x1x256xf32> to vector<2x256xf32>
    %4 = vector.broadcast %1 : f32 to vector<2x256xf32>
    %5 = arith.mulf %4, %3 : vector<2x256xf32>
    %c0_4 = arith.constant 0 : index
    %c1 = arith.constant 1 : index
    %6 = memref.load %arg2[%c0_4, %c1] : memref<4x4xf32, #tpu.memory_space<smem>>
    %7 = vector.extract_strided_slice %0 {offsets = [0, 1, 0], sizes = [2, 1, 256], strides = [1, 1, 1]} : vector<2x4x256xf32> to vector<2x1x256xf32>
    %8 = vector.shape_cast %7 : vector<2x1x256xf32> to vector<2x256xf32>
    %9 = vector.broadcast %6 : f32 to vector<2x256xf32>
    %10 = arith.mulf %9, %8 : vector<2x256xf32>
    %11 = arith.addf %5, %10 : vector<2x256xf32>
    %c0_5 = arith.constant 0 : index
    %c2 = arith.constant 2 : index
    %12 = memref.load %arg2[%c0_5, %c2] : memref<4x4xf32, #tpu.memory_space<smem>>
    %13 = vector.extract_strided_slice %0 {offsets = [0, 2, 0], sizes = [2, 1, 256], strides = [1, 1, 1]} : vector<2x4x256xf32> to vector<2x1x256xf32>
    %14 = vector.shape_cast %13 : vector<2x1x256xf32> to vector<2x256xf32>
    %15 = vector.broadcast %12 : f32 to vector<2x256xf32>
    %16 = arith.mulf %15, %14 : vector<2x256xf32>
    %17 = arith.addf %11, %16 : vector<2x256xf32>
    %c0_6 = arith.constant 0 : index
    %c3 = arith.constant 3 : index
    %18 = memref.load %arg2[%c0_6, %c3] : memref<4x4xf32, #tpu.memory_space<smem>>
    %19 = vector.extract_strided_slice %0 {offsets = [0, 3, 0], sizes = [2, 1, 256], strides = [1, 1, 1]} : vector<2x4x256xf32> to vector<2x1x256xf32>
    %20 = vector.shape_cast %19 : vector<2x1x256xf32> to vector<2x256xf32>
    %21 = vector.broadcast %18 : f32 to vector<2x256xf32>
    %22 = arith.mulf %21, %20 : vector<2x256xf32>
    %23 = arith.addf %17, %22 : vector<2x256xf32>
    %c1_7 = arith.constant 1 : index
    %c0_8 = arith.constant 0 : index
    %24 = memref.load %arg2[%c1_7, %c0_8] : memref<4x4xf32, #tpu.memory_space<smem>>
    %25 = vector.extract_strided_slice %0 {offsets = [0, 0, 0], sizes = [2, 1, 256], strides = [1, 1, 1]} : vector<2x4x256xf32> to vector<2x1x256xf32>
    %26 = vector.shape_cast %25 : vector<2x1x256xf32> to vector<2x256xf32>
    %27 = vector.broadcast %24 : f32 to vector<2x256xf32>
    %28 = arith.mulf %27, %26 : vector<2x256xf32>
    %c1_9 = arith.constant 1 : index
    %c1_10 = arith.constant 1 : index
    %29 = memref.load %arg2[%c1_9, %c1_10] : memref<4x4xf32, #tpu.memory_space<smem>>
    %30 = vector.extract_strided_slice %0 {offsets = [0, 1, 0], sizes = [2, 1, 256], strides = [1, 1, 1]} : vector<2x4x256xf32> to vector<2x1x256xf32>
    %31 = vector.shape_cast %30 : vector<2x1x256xf32> to vector<2x256xf32>
    %32 = vector.broadcast %29 : f32 to vector<2x256xf32>
    %33 = arith.mulf %32, %31 : vector<2x256xf32>
    %34 = arith.addf %28, %33 : vector<2x256xf32>
    %c1_11 = arith.constant 1 : index
    %c2_12 = arith.constant 2 : index
    %35 = memref.load %arg2[%c1_11, %c2_12] : memref<4x4xf32, #tpu.memory_space<smem>>
    %36 = vector.extract_strided_slice %0 {offsets = [0, 2, 0], sizes = [2, 1, 256], strides = [1, 1, 1]} : vector<2x4x256xf32> to vector<2x1x256xf32>
    %37 = vector.shape_cast %36 : vector<2x1x256xf32> to vector<2x256xf32>
    %38 = vector.broadcast %35 : f32 to vector<2x256xf32>
    %39 = arith.mulf %38, %37 : vector<2x256xf32>
    %40 = arith.addf %34, %39 : vector<2x256xf32>
    %c1_13 = arith.constant 1 : index
    %c3_14 = arith.constant 3 : index
    %41 = memref.load %arg2[%c1_13, %c3_14] : memref<4x4xf32, #tpu.memory_space<smem>>
    %42 = vector.extract_strided_slice %0 {offsets = [0, 3, 0], sizes = [2, 1, 256], strides = [1, 1, 1]} : vector<2x4x256xf32> to vector<2x1x256xf32>
    %43 = vector.shape_cast %42 : vector<2x1x256xf32> to vector<2x256xf32>
    %44 = vector.broadcast %41 : f32 to vector<2x256xf32>
    %45 = arith.mulf %44, %43 : vector<2x256xf32>
    %46 = arith.addf %40, %45 : vector<2x256xf32>
    %c2_15 = arith.constant 2 : index
    %c0_16 = arith.constant 0 : index
    %47 = memref.load %arg2[%c2_15, %c0_16] : memref<4x4xf32, #tpu.memory_space<smem>>
    %48 = vector.extract_strided_slice %0 {offsets = [0, 0, 0], sizes = [2, 1, 256], strides = [1, 1, 1]} : vector<2x4x256xf32> to vector<2x1x256xf32>
    %49 = vector.shape_cast %48 : vector<2x1x256xf32> to vector<2x256xf32>
    %50 = vector.broadcast %47 : f32 to vector<2x256xf32>
    %51 = arith.mulf %50, %49 : vector<2x256xf32>
    %c2_17 = arith.constant 2 : index
    %c1_18 = arith.constant 1 : index
    %52 = memref.load %arg2[%c2_17, %c1_18] : memref<4x4xf32, #tpu.memory_space<smem>>
    %53 = vector.extract_strided_slice %0 {offsets = [0, 1, 0], sizes = [2, 1, 256], strides = [1, 1, 1]} : vector<2x4x256xf32> to vector<2x1x256xf32>
    %54 = vector.shape_cast %53 : vector<2x1x256xf32> to vector<2x256xf32>
    %55 = vector.broadcast %52 : f32 to vector<2x256xf32>
    %56 = arith.mulf %55, %54 : vector<2x256xf32>
    %57 = arith.addf %51, %56 : vector<2x256xf32>
    %c2_19 = arith.constant 2 : index
    %c2_20 = arith.constant 2 : index
    %58 = memref.load %arg2[%c2_19, %c2_20] : memref<4x4xf32, #tpu.memory_space<smem>>
    %59 = vector.extract_strided_slice %0 {offsets = [0, 2, 0], sizes = [2, 1, 256], strides = [1, 1, 1]} : vector<2x4x256xf32> to vector<2x1x256xf32>
    %60 = vector.shape_cast %59 : vector<2x1x256xf32> to vector<2x256xf32>
    %61 = vector.broadcast %58 : f32 to vector<2x256xf32>
    %62 = arith.mulf %61, %60 : vector<2x256xf32>
    %63 = arith.addf %57, %62 : vector<2x256xf32>
    %c2_21 = arith.constant 2 : index
    %c3_22 = arith.constant 3 : index
    %64 = memref.load %arg2[%c2_21, %c3_22] : memref<4x4xf32, #tpu.memory_space<smem>>
    %65 = vector.extract_strided_slice %0 {offsets = [0, 3, 0], sizes = [2, 1, 256], strides = [1, 1, 1]} : vector<2x4x256xf32> to vector<2x1x256xf32>
    %66 = vector.shape_cast %65 : vector<2x1x256xf32> to vector<2x256xf32>
    %67 = vector.broadcast %64 : f32 to vector<2x256xf32>
    %68 = arith.mulf %67, %66 : vector<2x256xf32>
    %69 = arith.addf %63, %68 : vector<2x256xf32>
    %c3_23 = arith.constant 3 : index
    %c0_24 = arith.constant 0 : index
    %70 = memref.load %arg2[%c3_23, %c0_24] : memref<4x4xf32, #tpu.memory_space<smem>>
    %71 = vector.extract_strided_slice %0 {offsets = [0, 0, 0], sizes = [2, 1, 256], strides = [1, 1, 1]} : vector<2x4x256xf32> to vector<2x1x256xf32>
    %72 = vector.shape_cast %71 : vector<2x1x256xf32> to vector<2x256xf32>
    %73 = vector.broadcast %70 : f32 to vector<2x256xf32>
    %74 = arith.mulf %73, %72 : vector<2x256xf32>
    %c3_25 = arith.constant 3 : index
    %c1_26 = arith.constant 1 : index
    %75 = memref.load %arg2[%c3_25, %c1_26] : memref<4x4xf32, #tpu.memory_space<smem>>
    %76 = vector.extract_strided_slice %0 {offsets = [0, 1, 0], sizes = [2, 1, 256], strides = [1, 1, 1]} : vector<2x4x256xf32> to vector<2x1x256xf32>
    %77 = vector.shape_cast %76 : vector<2x1x256xf32> to vector<2x256xf32>
    %78 = vector.broadcast %75 : f32 to vector<2x256xf32>
    %79 = arith.mulf %78, %77 : vector<2x256xf32>
    %80 = arith.addf %74, %79 : vector<2x256xf32>
    %c3_27 = arith.constant 3 : index
    %c2_28 = arith.constant 2 : index
    %81 = memref.load %arg2[%c3_27, %c2_28] : memref<4x4xf32, #tpu.memory_space<smem>>
    %82 = vector.extract_strided_slice %0 {offsets = [0, 2, 0], sizes = [2, 1, 256], strides = [1, 1, 1]} : vector<2x4x256xf32> to vector<2x1x256xf32>
    %83 = vector.shape_cast %82 : vector<2x1x256xf32> to vector<2x256xf32>
    %84 = vector.broadcast %81 : f32 to vector<2x256xf32>
    %85 = arith.mulf %84, %83 : vector<2x256xf32>
    %86 = arith.addf %80, %85 : vector<2x256xf32>
    %c3_29 = arith.constant 3 : index
    %c3_30 = arith.constant 3 : index
    %87 = memref.load %arg2[%c3_29, %c3_30] : memref<4x4xf32, #tpu.memory_space<smem>>
    %88 = vector.extract_strided_slice %0 {offsets = [0, 3, 0], sizes = [2, 1, 256], strides = [1, 1, 1]} : vector<2x4x256xf32> to vector<2x1x256xf32>
    %89 = vector.shape_cast %88 : vector<2x1x256xf32> to vector<2x256xf32>
    %90 = vector.broadcast %87 : f32 to vector<2x256xf32>
    %91 = arith.mulf %90, %89 : vector<2x256xf32>
    %92 = arith.addf %86, %91 : vector<2x256xf32>
    %93 = vector.shape_cast %23 : vector<2x256xf32> to vector<2x1x256xf32>
    %94 = vector.shape_cast %46 : vector<2x256xf32> to vector<2x1x256xf32>
    %95 = vector.shape_cast %69 : vector<2x256xf32> to vector<2x1x256xf32>
    %96 = vector.shape_cast %92 : vector<2x256xf32> to vector<2x1x256xf32>
    %97 = tpu.concatenate %93, %94, %95, %96 in 1 : vector<2x1x256xf32>, vector<2x1x256xf32>, vector<2x1x256xf32>, vector<2x1x256xf32> -> vector<2x4x256xf32>
    %c0_31 = arith.constant 0 : index
    %c0_32 = arith.constant 0 : index
    %c0_33 = arith.constant 0 : index
    %98 = vector.load %arg4[%c0_31, %c0_32, %c0_33] : memref<2x4x256xf32, #tpu.memory_space<vmem>>, vector<2x4x256xf32>
    tpu.vector_store %arg4[%c0_31, %c0_32, %c0_33], %97 {strides = array<i32>} : memref<2x4x256xf32, #tpu.memory_space<vmem>>, vector<2x4x256xf32>,
    return
  }
  func.func @transform_0(%arg0: i32, %arg1: i32) -> (i32, i32) {
    %c0_i32 = arith.constant 0 : i32
    %c0_i32_0 = arith.constant 0 : i32
    %c0_i32_1 = arith.constant 0 : i32
    return %c0_i32, %c0_i32_0 : i32, i32
  }
  func.func @transform_1(%arg0: i32, %arg1: i32) -> (i32, i32, i32) {
    %c0_i32 = arith.constant 0 : i32
    %c0_i32_0 = arith.constant 0 : i32
    return %arg0, %c0_i32, %arg1 : i32, i32, i32
  }
  func.func @transform_2(%arg0: i32, %arg1: i32) -> (i32, i32, i32) {
    %c0_i32 = arith.constant 0 : i32
    %c0_i32_0 = arith.constant 0 : i32
    return %arg0, %c0_i32, %arg1 : i32, i32, i32
  }
}

</mosaic_0001>

<bundles_post_ra>
// kernel: tpu_custom_call.1
= control target key start
LH: loop header
LB: loop body
LE: loop exit
PB: predicated region body
PF: predicated region fallthrough
CT: control target
= control target key end

     0   :  { %7 = vsyncpa [#allocation5], 0  ;;  %s549_s0 = inlined_call_operand.hbm [shape: f32[4,4], index: 0, kind: input, shape index: {}]   ;;  %s550_s1 = inlined_call_operand.hbm [shape: f32[2,4,256], index: 1, kind: input, shape index: {}]   ;;  %s551_s2 = inlined_call_operand.hbm [shape: f32[2,4,256], index: 2, kind: output, shape index: {}]  }
   0x1   :  { %8 = vsyncpa [#allocation3], 0 }
   0x2   :  { %9 = vsyncpa [#allocation4], 0  ;;  %s15_s11 = sshll.u32 %s549_s0, 4  ;;  %s23_s14 = sshll.u32 %s550_s1, 4  ;;  %s16_s11 = int_to_ptr.hbm [resolvable:$true] %s15_s11  ;;  %s24_s14 = int_to_ptr.hbm [resolvable:$true] %s23_s14 }
   0x3   :  { %s425_s15 = smov [#allocation2]   ;;  %s426_s16 = smov [#allocation6]  }
   0x4   :  { %18 = dma.hbm_to_smem %s16_s11, 64, %s425_s15, [#allocation5]  }
   0x5   :  { %s25_s17 = sshll.u32 %s426_s16, 4  ;;  %s427_s18 = smov 128   ;;  %s26_s17 = int_to_ptr.vmem [resolvable:$true] %s25_s17 }
   0x6   :  { %s428_s19 = smov 8  }
   0x7   :  { %31 = dma.hbm_to_vmem [thread:$0]  %s24_s14, 256, %s26_s17, [#allocation3], %s427_s18, %s427_s18, %s428_s19  }
   0x8   :  { %419 = dma.done.wait [#allocation5], 64  }
   0x9   :  { %420 = vsyncadd [#allocation5], 4294967232 }
   0xa   :  { %421 = dma.done.wait [#allocation3], 256  }
   0xb   :  { %422 = vsyncadd [#allocation3], 4294967040 }
   0xc   :  { %40 = sfence }
   0xd   :  { %s43_s0 = sld [smem:[#allocation2]]  ;;  %v458_v0 = vld [vmem:[#allocation6] sm:$0xff]  ;;  %v462_v1 = vld [vmem:[#allocation6 + $0x8] sm:$0xff]  ;;  %vm267_vm0 = vcmask 1040384   ;;  %vm272_vm1 = vcmask 1041408   ;;  %vm277_vm2 = vcmask 1042432  }
   0xe   :  { %s315_s20 = sld [smem:[#allocation2 + $0x1]]  ;;  %vm288_vm3 = vcmask 1043456   ;;  %s429_s6 = smov [#allocation7]  }
   0xf   :  { %s318_s1 = sld [smem:[#allocation2 + $0x2]]  ;;  %s299_s7 = sshll.u32 %s429_s6, 4  ;;  %s300_s7 = int_to_ptr.vmem [resolvable:$true] %s299_s7 }
  0x10   :  { %s454_s21 = sld [smem:[#allocation2 + $0x3]]  ;;  %s301_s10 = sshll.u32 %s551_s2, 4  ;;  %s302_s10 = int_to_ptr.hbm [resolvable:$true] %s301_s10 }
  0x11   :  { %s456_s22 = sld [smem:[#allocation2 + $0x80]] }
  0x12   :  { %s460_s23 = sld [smem:[#allocation2 + $0x81]] }
  0x13   :  { %v44_v2 = vstv %s43_s0  ;;  %s464_s24 = sld [smem:[#allocation2 + $0x82]] }
  0x14   :  { %v48_v3 = vstv %s315_s20  ;;  %s466_s25 = sld [smem:[#allocation2 + $0x83]]  ;;  %v45_v4 = vmul.f32 %v44_v2, %v458_v0  ;;  %v46_v10 = vmul.f32 %v44_v2, %v462_v1 }
  0x15   :  { %v49_v5 = vmul.f32 %v48_v3, %v458_v0  ;;  %v62_v6 = vstv %s318_s1  ;;  %s470_s26 = sld [smem:[#allocation2 + $0x100]]  ;;  %v50_v7 = vmul.f32 %v48_v3, %v462_v1 }
  0x16   :  { %v63_v8 = vmul.f32 %v62_v6, %v458_v0  ;;  %v76_v9 = vstv %s454_s21  ;;  %s475_s27 = sld [smem:[#allocation2 + $0x101]]  ;;  %v64_v11 = vmul.f32 %v62_v6, %v462_v1 }
  0x17   :  { %v316_v12 = vrot.slane %v49_v5, 9  ;;  %v77_v13 = vmul.f32 %v76_v9, %v458_v0  ;;  %v90_v14 = vstv %s456_s22  ;;  %s481_s28 = sld [smem:[#allocation2 + $0x102]]  ;;  %v317_v15 = vrot.slane %v50_v7, 9 }
  0x18   :  { %v319_v16 = vrot.slane %v63_v8, 10  ;;  %v91_v17 = vmul.f32 %v90_v14, %v458_v0  ;;  %v94_v18 = vstv %s460_s23  ;;  %s485_s29 = sld [smem:[#allocation2 + $0x103]]  ;;  %v320_v19 = vrot.slane %v64_v11, 10 }
  0x19   :  { %v59_v20 = vadd.f32 %v316_v12, %v45_v4  ;;  %v322_v21 = vrot.slane %v77_v13, 11  ;;  %v95_v22 = vmul.f32 %v94_v18, %v458_v0  ;;  %v108_v23 = vstv %s464_s24  ;;  %s489_s30 = sld [smem:[#allocation2 + $0x180]] }
  0x1a   :  { %v109_v24 = vmul.f32 %v108_v23, %v458_v0  ;;  %v122_v25 = vstv %s466_s25  ;;  %s493_s3 = sld [smem:[#allocation2 + $0x181]]  ;;  %v60_v26 = vadd.f32 %v317_v15, %v46_v10  ;;  %v78_v27 = vmul.f32 %v76_v9, %v462_v1 }
  0x1b   :  { %v73_v28 = vadd.f32 %v319_v16, %v59_v20  ;;  %v326_v29 = vrot.slane %v95_v22, 9  ;;  %v123_v30 = vmul.f32 %v122_v25, %v458_v0  ;;  %v136_v31 = vstv %s470_s26  ;;  %s498_s4 = sld [smem:[#allocation2 + $0x182]] }
  0x1c   :  { %v329_v32 = vrot.slane %v109_v24, 10  ;;  %v137_v33 = vmul.f32 %v136_v31, %v458_v0  ;;  %v140_v34 = vstv %s475_s27  ;;  %s502_s5 = sld [smem:[#allocation2 + $0x183]]  ;;  %v74_v35 = vadd.f32 %v320_v19, %v60_v26 }
  0x1d   :  { %v87_v36 = vadd.f32 %v322_v21, %v73_v28  ;;  %v105_v37 = vadd.f32 %v326_v29, %v91_v17  ;;  %v332_v38 = vrot.slane %v123_v30, 11  ;;  %v141_v39 = vmul.f32 %v140_v34, %v458_v0 }
  0x1e   :  { %v154_v40 = vstv %s481_s28  ;;  %v168_v41 = vstv %s485_s29  ;;  %v323_v42 = vrot.slane %v78_v27, 11  ;;  %v92_v43 = vmul.f32 %v90_v14, %v462_v1 }
  0x1f   :  { %v119_v44 = vadd.f32 %v329_v32, %v105_v37  ;;  %v336_v45 = vrot.slane %v141_v39, 9  ;;  %v155_v46 = vmul.f32 %v154_v40, %v458_v0  ;;  %v169_v47 = vmul.f32 %v168_v41, %v458_v0 }
  0x20   :  { %v182_v48 = vstv %s489_s30  ;;  %v186_v49 = vstv %s493_s3  ;;  %v229_v50 = vperm.slane %v87_v36, 0  ;;  %v230_v51 = vperm.slane %v87_v36, 4 }
  0x21   :  { %v133_v52 = vadd.f32 %v332_v38, %v119_v44  ;;  %v151_v53 = vadd.f32 %v336_v45, %v137_v33  ;;  %v339_v54 = vrot.slane %v155_v46, 10  ;;  %v342_v55 = vrot.slane %v169_v47, 11 }
  0x22   :  { %v183_v56 = vmul.f32 %v182_v48, %v458_v0  ;;  %v187_v57 = vmul.f32 %v186_v49, %v458_v0  ;;  %v200_v58 = vstv %s498_s4  ;;  %v214_v59 = vstv %s502_s5 }
  0x23   :  { %v165_v60 = vadd.f32 %v339_v54, %v151_v53  ;;  %v201_v61 = vmul.f32 %v200_v58, %v458_v0  ;;  %v215_v62 = vmul.f32 %v214_v59, %v458_v0  ;;  %v239_v63 = vperm.slane %v133_v52, 0 }
  0x24   :  { %v346_v2 = vrot.slane %v187_v57, 9  ;;  %v240_v3 = vperm.slane %v133_v52, 4  ;;  %v88_v4 = vadd.f32 %v323_v42, %v74_v35  ;;  %v96_v5 = vmul.f32 %v94_v18, %v462_v1 }
  0x25   :  { %v179_v6 = vadd.f32 %v342_v55, %v165_v60  ;;  %v349_v7 = vrot.slane %v201_v61, 10  ;;  %v352_v8 = vrot.slane %v215_v62, 11  ;;  %v268_v9 = vsel %vm267_vm0, %v229_v50, %v239_v63 }
  0x26   :  { %v197_v10 = vadd.f32 %v346_v2, %v183_v56  ;;  %v269_v11 = vsel %vm267_vm0, %v230_v51, %v240_v3  ;;  %v327_v12 = vrot.slane %v96_v5, 9  ;;  %v110_v13 = vmul.f32 %v108_v23, %v462_v1 }
  0x27   :  { %v249_v0 = vperm.slane %v179_v6, 0  ;;  %v250_v14 = vperm.slane %v179_v6, 4  ;;  %v124_v15 = vmul.f32 %v122_v25, %v462_v1  ;;  %v138_v16 = vmul.f32 %v136_v31, %v462_v1 }
  0x28   :  { %v211_v17 = vadd.f32 %v349_v7, %v197_v10  ;;  %v106_v18 = vadd.f32 %v327_v12, %v92_v43  ;;  %v330_v19 = vrot.slane %v110_v13, 10  ;;  %v142_v20 = vmul.f32 %v140_v34, %v462_v1 }
  0x29   :  { %v273_v21 = vsel %vm272_vm1, %v268_v9, %v249_v0  ;;  %v274_v22 = vsel %vm272_vm1, %v269_v11, %v250_v14  ;;  %v333_v24 = vrot.slane %v124_v15, 11  ;;  %v156_v26 = vmul.f32 %v154_v40, %v462_v1 }
  0x2a   :  { %v225_v27 = vadd.f32 %v352_v8, %v211_v17  ;;  %v120_v23 = vadd.f32 %v330_v19, %v106_v18  ;;  %v337_v28 = vrot.slane %v142_v20, 9  ;;  %v170_v29 = vmul.f32 %v168_v41, %v462_v1 }
  0x2b   :  { %v340_v25 = vrot.slane %v156_v26, 10  ;;  %v184_v30 = vmul.f32 %v182_v48, %v462_v1  ;;  %v188_v31 = vmul.f32 %v186_v49, %v462_v1  ;;  %v202_v32 = vmul.f32 %v200_v58, %v462_v1 }
  0x2c   :  { %v259_v33 = vperm.slane %v225_v27, 0  ;;  %v260_v34 = vperm.slane %v225_v27, 4  ;;  %v134_v35 = vadd.f32 %v333_v24, %v120_v23  ;;  %v152_v36 = vadd.f32 %v337_v28, %v138_v16 }
  0x2d   :  { %v343_v37 = vrot.slane %v170_v29, 11  ;;  %v347_v38 = vrot.slane %v188_v31, 9  ;;  %v350_v39 = vrot.slane %v202_v32, 10  ;;  %v216_v40 = vmul.f32 %v214_v59, %v462_v1 }
  0x2e   :  { %v278_v42 = vsel %vm277_vm2, %v273_v21, %v259_v33  ;;  %v279_v41 = vsel %vm277_vm2, %v274_v22, %v260_v34  ;;  %v166_v43 = vadd.f32 %v340_v25, %v152_v36  ;;  %v231_v44 = vperm.slane %v88_v4, 0 }
  0x2f   :  { %v286_v45 = vrot.slane %v279_v41, 4  ;;  %v198_v46 = vadd.f32 %v347_v38, %v184_v30  ;;  %v353_v47 = vrot.slane %v216_v40, 11  ;;  %v232_v48 = vperm.slane %v88_v4, 4 }
  0x30   :  { %v180_v49 = vadd.f32 %v343_v37, %v166_v43  ;;  %v241_v50 = vperm.slane %v134_v35, 0  ;;  %v242_v51 = vperm.slane %v134_v35, 4 }
  0x31   :  { %v289_v52 = vsel %vm288_vm3, %v278_v42, %v286_v45  ;;  %v212_v53 = vadd.f32 %v350_v39, %v198_v46 }
  0x32   :  { %293 = vst [vmem:[#allocation7] sm:$0xff] %v289_v52  ;;  %v251_v54 = vperm.slane %v180_v49, 0  ;;  %v252_v55 = vperm.slane %v180_v49, 4  ;;  %v270_v1 = vsel %vm267_vm0, %v231_v44, %v241_v50  ;;  %v271_v56 = vsel %vm267_vm0, %v232_v48, %v242_v51 }
  0x33   :  { %v226_v57 = vadd.f32 %v353_v47, %v212_v53 }
  0x34   :  { %v275_v58 = vsel %vm272_vm1, %v270_v1, %v251_v54  ;;  %v276_v59 = vsel %vm272_vm1, %v271_v56, %v252_v55 }
  0x35   :  { %v261_v60 = vperm.slane %v226_v57, 0  ;;  %v262_v61 = vperm.slane %v226_v57, 4 }
  0x37   :  { %v280_v62 = vsel %vm277_vm2, %v275_v58, %v261_v60  ;;  %v281_v63 = vsel %vm277_vm2, %v276_v59, %v262_v61 }
  0x38   :  { %v287_v2 = vrot.slane %v281_v63, 4 }
  0x3a   :  { %v290_v3 = vsel %vm288_vm3, %v280_v62, %v287_v2 }
  0x3b   :  { %294 = vst [vmem:[#allocation7 + $0x8] sm:$0xff] %v290_v3 }
  0x3c   :  { %307 = dma.vmem_to_hbm [thread:$0]  %s300_s7, 256, %s302_s10, [#allocation4], %s427_s18, %s427_s18, %s428_s19  }
  0x3d   :  { %423 = dma.done.wait [#allocation4], 256  }
  0x3e   :  { %424 = vsyncadd [#allocation4], 4294967040 }
  0x3f   :  { %312 = vsyncpa [#allocation3], 1 }
  0x40   :  { %313 = vsyncpa [#allocation4], 1 }
  0x41   :  { %314 = vsyncpa [#allocation5], 1 }

</bundles_post_ra>
